<compile_context>
chip_gen: v7x
topology: tpu7x:2x2x1
jax: 0.10.0
libtpu: 0.0.40
codegen_flags: <defaults>
</compile_context>

<pallas_src>
import functools
from math import ceil, sqrt

import jax
import jax.numpy as jnp
from jax.experimental import pallas as pl
from jax.experimental.pallas import tpu as pltpu


def _smooth_kernel(x_ref, noise_ref, w_ref, b_ref, logits_ref,
                   *, n_batches, noise_scale):
    """One K-tile of:  logits = (n_batches*x + noise_scale*eps) @ W + n_batches*b."""
    k = pl.program_id(0)

    @pl.when(k == 0)
    def _():
        logits_ref[...] = jnp.zeros_like(logits_ref)

    # Noise-summed input for this K tile (Gaussian closure collapses the whole
    # Monte-Carlo loop into one scaled standard-normal draw).
    z = (float(n_batches) * x_ref[...]
         + float(noise_scale) * noise_ref[...])                      # (1, tk)
    logits_ref[...] += jnp.dot(z, w_ref[...],
                               preferred_element_type=jnp.float32)   # (1, Cpad)

    @pl.when(k == pl.num_programs(0) - 1)
    def _():
        # Bias hoisted out of the loop: added once per noise batch in the epilogue.
        logits_ref[...] += float(n_batches) * b_ref[...]


def _pick_tile_k(d, max_tile=16384):
    """Largest multiple of 128 that divides d (capped), else d itself."""
    t = (min(d, max_tile) // 128) * 128
    while t >= 128:
        if d % t == 0:
            return t
        t -= 128
    return d


def smooth_forward(x_chw, w, b, *, sigma, n, batch_size, seed):
    """Fused forward pass of `Smooth` with a linear base classifier.

    Returns (logits[1, num_classes], z_sum[1, D], n_batches, noise_scale) where
      z_sum  = sum over noise batches of (x + sigma * mean_batch(N(0,1)))
             = n_batches * x + noise_scale * N(0, I_D)
      logits = z_sum @ W + n_batches * b          (computed inside the kernel)
    """
    C, H, W = x_chw.shape
    D = C * H * W
    num_classes = w.shape[1]

    # Exact noise-batch bookkeeping, including the ragged tail batch
    # (min(batch_size, remaining)) of the PyTorch loop.
    n_full = n // batch_size
    rem = n % batch_size
    n_batches = n_full + (1 if rem else 0)
    var = n_full / batch_size + ((1.0 / rem) if rem else 0.0)
    noise_scale = float(sigma) * sqrt(var)

    # One tiny (1, D) standard-normal draw replaces all (n, D) noise samples.
    noise = jax.random.normal(jax.random.PRNGKey(seed), (1, D), dtype=jnp.float32)

    # Pad the class dim to a full 128-lane tile -> unmasked stores; slice on host.
    c_pad = max(128, 128 * ceil(num_classes / 128))
    w_pad = jnp.zeros((D, c_pad), jnp.float32).at[:, :num_classes].set(
        w.astype(jnp.float32))
    b_pad = jnp.zeros((1, c_pad), jnp.float32).at[:, :num_classes].set(
        b.astype(jnp.float32))

    x_flat = x_chw.reshape(1, D).astype(jnp.float32)

    tk = _pick_tile_k(D)
    n_k = D // tk

    kernel = functools.partial(
        _smooth_kernel, n_batches=n_batches, noise_scale=noise_scale)

    logits_pad = pl.pallas_call(
        kernel,
        out_shape=jax.ShapeDtypeStruct((1, c_pad), jnp.float32),
        grid_spec=pltpu.PrefetchScalarGridSpec(
            num_scalar_prefetch=0,
            grid=(n_k,),
            in_specs=[
                pl.BlockSpec((1, tk), lambda k: (0, k)),       # x tile
                pl.BlockSpec((1, tk), lambda k: (0, k)),       # noise tile
                pl.BlockSpec((tk, c_pad), lambda k: (k, 0)),   # W tile (read once)
                pl.BlockSpec((1, c_pad), lambda k: (0, 0)),    # bias (resident)
            ],
            out_specs=pl.BlockSpec((1, c_pad), lambda k: (0, 0)),  # resident acc
        ),
        compiler_params=pltpu.CompilerParams(
            dimension_semantics=("arbitrary",),   # K is a reduction axis
        ),
    )(x_flat, noise, w_pad, b_pad)

    logits = logits_pad[:, :num_classes]
    z_sum = n_batches * x_flat + noise_scale * noise  # for host-side verification
    return logits, z_sum, n_batches, noise_scale


if __name__ == "__main__":
    # Small, deterministic configuration consistent with the module.
    C, H, W = 4, 16, 16
    D = C * H * W
    num_classes = 10
    sigma = 0.25
    batch_size = 128
    n = 500                  # NOT a multiple of batch_size: exercises the ragged tail

    key = jax.random.PRNGKey(0)
    k_x, k_w, k_b = jax.random.split(key, 3)

    # Input image [C, H, W] (the module's forward takes a single image).
    x = jax.random.normal(k_x, (C, H, W), dtype=jnp.float32)

    # Deterministic linear base classifier: flatten -> logits.
    w = jax.random.normal(k_w, (D, num_classes), dtype=jnp.float32) * 0.02
    b = jax.random.normal(k_b, (1, num_classes), dtype=jnp.float32) * 0.1

    logits, z_sum, n_batches, noise_scale = smooth_forward(
        x, w, b, sigma=sigma, n=n, batch_size=batch_size, seed=1234)
    logits, z_sum = jax.block_until_ready((logits, z_sum))

    # Exact check of the fused (reduce -> matvec -> hoisted bias) compute by
    # replaying the linear head host-side on the same noise-summed input.
    ref = jnp.dot(z_sum, w, precision=jax.lax.Precision.HIGHEST) + n_batches * b
    assert logits.shape == (1, num_classes)
    assert jnp.allclose(logits, ref, atol=1e-2, rtol=1e-2), (logits, ref)

    # Statistical check of the (collapsed) Gaussian noise: the per-pixel mean of
    # the noise contribution over all noise batches should be ~ N(0, (scale/n_b)^2).
    noise_mean = z_sum / n_batches - x.reshape(1, D)
    expected_std = noise_scale / n_batches
    emp_std = float(jnp.std(noise_mean))
    emp_mean = float(jnp.mean(noise_mean))
    assert 0.5 * expected_std < emp_std < 2.0 * expected_std, (emp_std, expected_std)
    assert abs(emp_mean) < 0.3 * expected_std, (emp_mean, expected_std)

    print("KERNEL_OK")
</pallas_src>

<mosaic_0001>
module attributes {stable_mosaic.version = 11 : i64} {
  func.func @_smooth_kernel(%arg0: i32, %arg1: memref<1x1024xf32, #tpu.memory_space<vmem>>, %arg2: memref<1x1024xf32, #tpu.memory_space<vmem>>, %arg3: memref<1024x128xf32, #tpu.memory_space<vmem>>, %arg4: memref<1x128xf32, #tpu.memory_space<vmem>>, %arg5: memref<1x128xf32, #tpu.memory_space<vmem>>) attributes {dimension_semantics = [#tpu.dimension_semantics<arbitrary>], iteration_bounds = array<i64: 1>, scalar_prefetch = 0 : i64, scratch_operands = 0 : i64, tpu.core_type = #tpu.core_type<tc>, window_params = [{transform_indices = @transform_0, window_bounds = array<i64: 1, 1024>}, {transform_indices = @transform_1, window_bounds = array<i64: 1, 1024>}, {transform_indices = @transform_2, window_bounds = array<i64: 1024, 128>}, {pipeline_mode = #tpu.pipeline_mode<synchronous>, transform_indices = @transform_3, window_bounds = array<i64: 1, 128>}, {pipeline_mode = #tpu.pipeline_mode<synchronous>, transform_indices = @transform_4, window_bounds = array<i64: 1, 128>}]} {
    %c0_i32 = arith.constant 0 : i32
    %0 = arith.cmpi eq, %arg0, %c0_i32 : i32
    %1 = arith.extui %0 : i1 to i32
    %c0_i32_0 = arith.constant 0 : i32
    %2 = arith.cmpi ne, %1, %c0_i32_0 : i32
    scf.if %2 {
      %cst_14 = arith.constant 0.000000e+00 : f32
      %18 = vector.broadcast %cst_14 : f32 to vector<1x128xf32>
      %c0_15 = arith.constant 0 : index
      %c0_16 = arith.constant 0 : index
      %19 = vector.load %arg5[%c0_15, %c0_16] : memref<1x128xf32, #tpu.memory_space<vmem>>, vector<1x128xf32>
      tpu.vector_store %arg5[%c0_15, %c0_16], %18 {strides = array<i32>} : memref<1x128xf32, #tpu.memory_space<vmem>>, vector<1x128xf32>,
    } else {
    }
    %c0 = arith.constant 0 : index
    %c0_1 = arith.constant 0 : index
    %3 = vector.load %arg1[%c0, %c0_1] : memref<1x1024xf32, #tpu.memory_space<vmem>>, vector<1x1024xf32>
    %cst = arith.constant 4.000000e+00 : f32
    %4 = vector.broadcast %cst : f32 to vector<1x1024xf32>
    %5 = arith.mulf %4, %3 : vector<1x1024xf32>
    %c0_2 = arith.constant 0 : index
    %c0_3 = arith.constant 0 : index
    %6 = vector.load %arg2[%c0_2, %c0_3] : memref<1x1024xf32, #tpu.memory_space<vmem>>, vector<1x1024xf32>
    %cst_4 = arith.constant 0.0447620042 : f32
    %7 = vector.broadcast %cst_4 : f32 to vector<1x1024xf32>
    %8 = arith.mulf %7, %6 : vector<1x1024xf32>
    %9 = arith.addf %5, %8 : vector<1x1024xf32>
    %c0_5 = arith.constant 0 : index
    %c0_6 = arith.constant 0 : index
    %10 = vector.load %arg5[%c0_5, %c0_6] : memref<1x128xf32, #tpu.memory_space<vmem>>, vector<1x128xf32>
    %c0_7 = arith.constant 0 : index
    %c0_8 = arith.constant 0 : index
    %11 = vector.load %arg3[%c0_7, %c0_8] : memref<1024x128xf32, #tpu.memory_space<vmem>>, vector<1024x128xf32>
    %cst_9 = arith.constant dense<0.000000e+00> : vector<1x128xf32>
    %12 = tpu.matmul %9, %11, %cst_9 {dimension_numbers = #tpu.dot_dimension_numbers<[1], [0], [0], [1], [0, 0, 1, 1], [], []>} : vector<1x1024xf32>, vector<1024x128xf32>, vector<1x128xf32> -> vector<1x128xf32>
    %13 = arith.addf %10, %12 : vector<1x128xf32>
    %c0_10 = arith.constant 0 : index
    %c0_11 = arith.constant 0 : index
    %14 = vector.load %arg5[%c0_10, %c0_11] : memref<1x128xf32, #tpu.memory_space<vmem>>, vector<1x128xf32>
    tpu.vector_store %arg5[%c0_10, %c0_11], %13 {strides = array<i32>} : memref<1x128xf32, #tpu.memory_space<vmem>>, vector<1x128xf32>,
    %c0_i32_12 = arith.constant 0 : i32
    %15 = arith.cmpi eq, %arg0, %c0_i32_12 : i32
    %16 = arith.extui %15 : i1 to i32
    %c0_i32_13 = arith.constant 0 : i32
    %17 = arith.cmpi ne, %16, %c0_i32_13 : i32
    scf.if %17 {
      %c0_14 = arith.constant 0 : index
      %c0_15 = arith.constant 0 : index
      %18 = vector.load %arg5[%c0_14, %c0_15] : memref<1x128xf32, #tpu.memory_space<vmem>>, vector<1x128xf32>
      %c0_16 = arith.constant 0 : index
      %c0_17 = arith.constant 0 : index
      %19 = vector.load %arg4[%c0_16, %c0_17] : memref<1x128xf32, #tpu.memory_space<vmem>>, vector<1x128xf32>
      %cst_18 = arith.constant 4.000000e+00 : f32
      %20 = vector.broadcast %cst_18 : f32 to vector<1x128xf32>
      %21 = arith.mulf %20, %19 : vector<1x128xf32>
      %22 = arith.addf %18, %21 : vector<1x128xf32>
      %c0_19 = arith.constant 0 : index
      %c0_20 = arith.constant 0 : index
      %23 = vector.load %arg5[%c0_19, %c0_20] : memref<1x128xf32, #tpu.memory_space<vmem>>, vector<1x128xf32>
      tpu.vector_store %arg5[%c0_19, %c0_20], %22 {strides = array<i32>} : memref<1x128xf32, #tpu.memory_space<vmem>>, vector<1x128xf32>,
    } else {
    }
    return
  }
  func.func @transform_0(%arg0: i32) -> (i32, i32) {
    %c0_i32 = arith.constant 0 : i32
    %c0_i32_0 = arith.constant 0 : i32
    return %c0_i32, %arg0 : i32, i32
  }
  func.func @transform_1(%arg0: i32) -> (i32, i32) {
    %c0_i32 = arith.constant 0 : i32
    %c0_i32_0 = arith.constant 0 : i32
    return %c0_i32, %arg0 : i32, i32
  }
  func.func @transform_2(%arg0: i32) -> (i32, i32) {
    %c0_i32 = arith.constant 0 : i32
    %c0_i32_0 = arith.constant 0 : i32
    return %arg0, %c0_i32 : i32, i32
  }
  func.func @transform_3(%arg0: i32) -> (i32, i32) {
    %c0_i32 = arith.constant 0 : i32
    %c0_i32_0 = arith.constant 0 : i32
    %c0_i32_1 = arith.constant 0 : i32
    return %c0_i32, %c0_i32_0 : i32, i32
  }
  func.func @transform_4(%arg0: i32) -> (i32, i32) {
    %c0_i32 = arith.constant 0 : i32
    %c0_i32_0 = arith.constant 0 : i32
    %c0_i32_1 = arith.constant 0 : i32
    return %c0_i32, %c0_i32_0 : i32, i32
  }
}

</mosaic_0001>

<bundles_post_ra>
// kernel: tpu_custom_call.1
= control target key start
LH: loop header
LB: loop body
LE: loop exit
PB: predicated region body
PF: predicated region fallthrough
CT: control target
= control target key end

     0   :  { %9 = vsyncpa [#allocation3], 0  ;;  %s1013_s0 = inlined_call_operand.hbm [shape: f32[1,1024], index: 0, kind: input, shape index: {}]   ;;  %s1014_s1 = inlined_call_operand.hbm [shape: f32[1,1024], index: 1, kind: input, shape index: {}]   ;;  %s1015_s2 = inlined_call_operand.hbm [shape: f32[1024,128], index: 2, kind: input, shape index: {}]   ;;  %s1016_s3 = inlined_call_operand.vmem [shape: f32[1,128], index: 3, kind: input, shape index: {}]   ;;  %s1017_s4 = inlined_call_operand.hbm [shape: f32[1,128], index: 4, kind: output, shape index: {}]  }
   0x1   :  { %10 = vsyncpa [#allocation6], 0 }
   0x2   :  { %11 = vsyncpa [#allocation4], 0  ;;  %s910_s15 = smov [#allocation5]   ;;  %s911_s17 = smov [#allocation2]  }
   0x3   :  { %s28_s16 = sshll.u32 %s910_s15, 4  ;;  %s18_s18 = sshll.u32 %s911_s17, 4  ;;  %s29_s16 = int_to_ptr.vmem [resolvable:$true] %s28_s16  ;;  %s19_s18 = int_to_ptr.vmem [resolvable:$true] %s18_s18 }
   0x4   :  { %s816_s21 = scalar_lea.hbm %s1014_s1, 128 }
   0x5   :  { %p817_p0 = scmp.ne.s32.totalorder %s1014_s1, %s816_s21  ;;  %p820_p1 = scmp.lt.u32.totalorder %s816_s21, %s1014_s1 }
   0x7   :  { %p822_p2 = pnand %p820_p1, %p817_p0 }
   0x9   :  { %825 = shalt.err (!%p822_p2)
}
   0xa   :  { %s826_s26 = scalar_lea.vmem %s29_s16, 128  ;;  %p831_p4 = scmp.lt.s32.totalorder %s29_s16, %s29_s16 }
   0xb   :  { %p827_p3 = scmp.ne.s32.totalorder %s29_s16, %s826_s26  ;;  %p832_p5 = scmp.lt.s32.totalorder %s826_s26, %s826_s26 }
   0xd   :  { %p833_p6 = por %p832_p5, %p831_p4 }
   0xf   :  { %p834_p7 = pnand %p833_p6, %p827_p3 }
  0x11   :  { %837 = shalt.err (!%p834_p7)
}
  0x12   :  { %31 = dma.hbm_to_vmem [thread:$0]  %s1014_s1, 128, %s29_s16, [#allocation6]  }
  0x13   :  { %s838_s5 = scalar_lea.hbm %s1013_s0, 128 }
  0x14   :  { %p839_p8 = scmp.ne.s32.totalorder %s1013_s0, %s838_s5  ;;  %p842_p9 = scmp.lt.u32.totalorder %s838_s5, %s1013_s0 }
  0x16   :  { %p844_p10 = pnand %p842_p9, %p839_p8 }
  0x18   :  { %847 = shalt.err (!%p844_p10)
}
  0x19   :  { %s848_s10 = scalar_lea.vmem %s19_s18, 128  ;;  %p853_p12 = scmp.lt.s32.totalorder %s19_s18, %s19_s18 }
  0x1a   :  { %p849_p11 = scmp.ne.s32.totalorder %s19_s18, %s848_s10  ;;  %p854_p13 = scmp.lt.s32.totalorder %s848_s10, %s848_s10 }
  0x1c   :  { %p855_p0 = por %p854_p13, %p853_p12 }
  0x1e   :  { %p856_p1 = pnand %p855_p0, %p849_p11 }
  0x20   :  { %859 = shalt.err (!%p856_p1)
}
  0x21   :  { %21 = dma.hbm_to_vmem [thread:$0]  %s1013_s0, 128, %s19_s18, [#allocation3]  }
  0x22   :  { %s912_s12 = smov [#allocation7]   ;;  %s860_s16 = scalar_lea.hbm %s1015_s2, 16384 }
  0x23   :  { %s37_s13 = sshll.u32 %s912_s12, 4  ;;  %p861_p2 = scmp.ne.s32.totalorder %s1015_s2, %s860_s16  ;;  %s38_s13 = int_to_ptr.vmem [resolvable:$true] %s37_s13 }
  0x24   :  { %p864_p3 = scmp.lt.u32.totalorder %s860_s16, %s1015_s2 }
  0x26   :  { %p866_p4 = pnand %p864_p3, %p861_p2 }
  0x28   :  { %869 = shalt.err (!%p866_p4)
}
  0x29   :  { %s870_s22 = scalar_lea.vmem %s38_s13, 16384  ;;  %p875_p6 = scmp.lt.s32.totalorder %s38_s13, %s38_s13 }
  0x2a   :  { %p871_p5 = scmp.ne.s32.totalorder %s38_s13, %s870_s22  ;;  %p876_p7 = scmp.lt.s32.totalorder %s870_s22, %s870_s22 }
  0x2c   :  { %p877_p8 = por %p876_p7, %p875_p6 }
  0x2e   :  { %p878_p9 = pnand %p877_p8, %p871_p5 }
  0x30   :  { %881 = shalt.err (!%p878_p9)
}
  0x31   :  { %s913_s0 = smov 128   ;;  %s914_s18 = smov 8  }
  0x32   :  { %43 = dma.hbm_to_vmem [thread:$0]  %s1015_s2, 16384, %s38_s13, [#allocation6], %s913_s0, %s913_s0, %s914_s18  }
  0x33   :  { %904 = dma.done.wait [#allocation3], 128  }
  0x34   :  { %905 = vsyncadd [#allocation3], 4294967168 }
  0x35   :  { %906 = dma.done.wait [#allocation6], 16512  }
  0x36   :  { %907 = vsyncadd [#allocation6], 4294950784  ;;  %v82_v0 = vld [vmem:[#allocation7 + $0x80] sm:$0xff]  ;;  %v83_v1 = vld [vmem:[#allocation7 + $0x88] sm:$0xff]  ;;  %v195_v56 = vlaneseq  ;;  %s916_s26 = smov [#allocation8]  }
  0x37   :  { %v114_v2 = vld [vmem:[#allocation7 + $0x180] sm:$0xff]  ;;  %v681_v3 = vpack.c.bf16 %v83_v1, %v82_v0  ;;  %v115_v4 = vld [vmem:[#allocation7 + $0x188] sm:$0xff]  ;;  %v84_v11 = vld [vmem:[#allocation7 + $0x90] sm:$0xff]  ;;  %s531_s27 = sshll.u32 %s916_s26, 4  ;;  %s532_s27 = int_to_ptr.vmem [resolvable:$true] %s531_s27 }
  0x38   :  { %v66_v5 = vld [vmem:[#allocation7] sm:$0xff]  ;;  %v67_v6 = vld [vmem:[#allocation7 + $0x8] sm:$0xff]  ;;  %v713_v7 = vpack.c.bf16 %v115_v4, %v114_v2  ;;  %v85_v13 = vld [vmem:[#allocation7 + $0x98] sm:$0xff]  ;;  %s882_s28 = scalar_lea.vmem %s532_s27, 16  ;;  %s886_s29 = scalar_lea.vmem %s532_s27, 32 }
  0x39   :  { %v683_v8 = vpack.c.bf16 %v67_v6, %v66_v5  ;;  %v98_v9 = vld [vmem:[#allocation7 + $0x100] sm:$0xff]  ;;  %v99_v10 = vld [vmem:[#allocation7 + $0x108] sm:$0xff]  ;;  %682 = vmatprep.subr.bf16.mxu0 %v681_v3  ;;  %v116_v14 = vld [vmem:[#allocation7 + $0x190] sm:$0xff]  ;;  %v685_v16 = vpack.c.bf16 %v85_v13, %v84_v11  ;;  %v978_v5 = vshrl.u32 %v195_v56, 7  ;;  %p883_p10 = scmp.ne.s32.totalorder %s532_s27, %s882_s28  ;;  %p887_p11 = scmp.lt.s32.totalorder %s532_s27, %s532_s27 }
  0x3a   :  { %v715_v12 = vpack.c.bf16 %v99_v10, %v98_v9  ;;  %v117_v15 = vld [vmem:[#allocation7 + $0x198] sm:$0xff]  ;;  %714 = vmatprep.subr.bf16.mxu1 %v713_v7  ;;  %v68_v18 = vld [vmem:[#allocation7 + $0x10] sm:$0xff]  ;;  %v86_v23 = vld [vmem:[#allocation7 + $0xa0] sm:$0xff]  ;;  %p888_p12 = scmp.lt.s32.totalorder %s886_s29, %s882_s28 }
  0x3b   :  { %684 = vmatpush3.bf16.msra.mxu0 %v683_v8  ;;  %v717_v17 = vpack.c.bf16 %v117_v15, %v116_v14  ;;  %v69_v19 = vld [vmem:[#allocation7 + $0x18] sm:$0xff]  ;;  %v100_v20 = vld [vmem:[#allocation7 + $0x110] sm:$0xff]  ;;  %v87_v24 = vld [vmem:[#allocation7 + $0xa8] sm:$0xff] }
  0x3c   :  { %716 = vmatpush3.bf16.msra.mxu1 %v715_v12  ;;  %v687_v21 = vpack.c.bf16 %v69_v19, %v68_v18  ;;  %v101_v22 = vld [vmem:[#allocation7 + $0x118] sm:$0xff]  ;;  %686 = vmatprep.subr.bf16.mxu0 %v685_v16  ;;  %v689_v26 = vpack.c.bf16 %v87_v24, %v86_v23  ;;  %v118_v27 = vld [vmem:[#allocation7 + $0x1a0] sm:$0xff]  ;;  %v119_v28 = vld [vmem:[#allocation7 + $0x1a8] sm:$0xff]  ;;  %p889_p13 = por %p888_p12, %p887_p11 }
  0x3d   :  { %718 = vmatprep.subr.bf16.mxu1 %v717_v17  ;;  %v719_v25 = vpack.c.bf16 %v101_v22, %v100_v20  ;;  %v70_v29 = vld [vmem:[#allocation7 + $0x20] sm:$0xff]  ;;  %v721_v30 = vpack.c.bf16 %v119_v28, %v118_v27  ;;  %v71_v31 = vld [vmem:[#allocation7 + $0x28] sm:$0xff]  ;;  %v88_v35 = vld [vmem:[#allocation7 + $0xb0] sm:$0xff]  ;;  %v201_v20 = vsub.s32 1, %v978_v5 }
  0x3e   :  { %v102_v32 = vld [vmem:[#allocation7 + $0x120] sm:$0xff]  ;;  %v103_v33 = vld [vmem:[#allocation7 + $0x128] sm:$0xff]  ;;  %v691_v34 = vpack.c.bf16 %v71_v31, %v70_v29  ;;  %v89_v36 = vld [vmem:[#allocation7 + $0xb8] sm:$0xff]  ;;  %p890_p0 = pnand %p889_p13, %p883_p10 }
  0x3f   :  { %688 = vmatpush3.bf16.msra.mxu0 %v687_v21  ;;  %v120_v37 = vld [vmem:[#allocation7 + $0x1b0] sm:$0xff]  ;;  %v723_v38 = vpack.c.bf16 %v103_v33, %v102_v32  ;;  %v693_v39 = vpack.c.bf16 %v89_v36, %v88_v35  ;;  %v121_v40 = vld [vmem:[#allocation7 + $0x1b8] sm:$0xff]  ;;  %v90_v46 = vld [vmem:[#allocation7 + $0xc0] sm:$0xff]  ;;  %v209_v21 = vsub.s32 3, %v978_v5 }
  0x40   :  { %720 = vmatpush3.bf16.msra.mxu1 %v719_v25  ;;  %690 = vmatprep.subr.bf16.mxu0 %v689_v26  ;;  %v72_v41 = vld [vmem:[#allocation7 + $0x30] sm:$0xff]  ;;  %v73_v42 = vld [vmem:[#allocation7 + $0x38] sm:$0xff]  ;;  %v725_v43 = vpack.c.bf16 %v121_v40, %v120_v37  ;;  %v91_v47 = vld [vmem:[#allocation7 + $0xc8] sm:$0xff] }
  0x41   :  { %722 = vmatprep.subr.bf16.mxu1 %v721_v30  ;;  %v104_v44 = vld [vmem:[#allocation7 + $0x130] sm:$0xff]  ;;  %v105_v45 = vld [vmem:[#allocation7 + $0x138] sm:$0xff]  ;;  %v122_v48 = vld [vmem:[#allocation7 + $0x1c0] sm:$0xff]  ;;  %v695_v50 = vpack.c.bf16 %v73_v42, %v72_v41  ;;  %v697_v52 = vpack.c.bf16 %v91_v47, %v90_v46  ;;  %v205_v47 = vsub.s32 2, %v978_v5 }
  0x42   :  { %v123_v49 = vld [vmem:[#allocation7 + $0x1c8] sm:$0xff]  ;;  %v727_v51 = vpack.c.bf16 %v105_v45, %v104_v44  ;;  %v74_v53 = vld [vmem:[#allocation7 + $0x40] sm:$0xff]  ;;  %v92_v59 = vld [vmem:[#allocation7 + $0xd0] sm:$0xff] }
  0x43   :  { %692 = vmatpush3.bf16.msra.mxu0 %v691_v34  ;;  %v75_v54 = vld [vmem:[#allocation7 + $0x48] sm:$0xff]  ;;  %v106_v55 = vld [vmem:[#allocation7 + $0x140] sm:$0xff]  ;;  %v729_v57 = vpack.c.bf16 %v123_v49, %v122_v48  ;;  %v93_v60 = vld [vmem:[#allocation7 + $0xd8] sm:$0xff] }
  0x44   :  { %724 = vmatpush3.bf16.msra.mxu1 %v723_v38  ;;  %694 = vmatprep.subr.bf16.mxu0 %v693_v39  ;;  %v107_v58 = vld [vmem:[#allocation7 + $0x148] sm:$0xff]  ;;  %v124_v61 = vld [vmem:[#allocation7 + $0x1d0] sm:$0xff]  ;;  %v125_v62 = vld [vmem:[#allocation7 + $0x1d8] sm:$0xff]  ;;  %v699_v63 = vpack.c.bf16 %v75_v54, %v74_v53  ;;  %v701_v1 = vpack.c.bf16 %v93_v60, %v92_v59 }
  0x45   :  { %726 = vmatprep.subr.bf16.mxu1 %v725_v43  ;;  %v731_v0 = vpack.c.bf16 %v107_v58, %v106_v55  ;;  %v76_v2 = vld [vmem:[#allocation7 + $0x50] sm:$0xff]  ;;  %v77_v3 = vld [vmem:[#allocation7 + $0x58] sm:$0xff]  ;;  %v733_v6 = vpack.c.bf16 %v125_v62, %v124_v61  ;;  %v94_v8 = vld [vmem:[#allocation7 + $0xe0] sm:$0xff]  ;;  %v197_v43 = vsub.s32 0, %v978_v5  ;;  %v225_v61 = vsub.s32 7, %v978_v5 }
  0x46   :  { %v108_v4 = vld [vmem:[#allocation7 + $0x150] sm:$0xff]  ;;  %v109_v7 = vld [vmem:[#allocation7 + $0x158] sm:$0xff]  ;;  %v95_v9 = vld [vmem:[#allocation7 + $0xe8] sm:$0xff]  ;;  %v703_v12 = vpack.c.bf16 %v77_v3, %v76_v2 }
  0x47   :  { %696 = vmatpush3.bf16.msra.mxu0 %v695_v50  ;;  %v126_v10 = vld [vmem:[#allocation7 + $0x1e0] sm:$0xff]  ;;  %v127_v11 = vld [vmem:[#allocation7 + $0x1e8] sm:$0xff]  ;;  %v735_v15 = vpack.c.bf16 %v109_v7, %v108_v4  ;;  %v705_v16 = vpack.c.bf16 %v95_v9, %v94_v8  ;;  %v60_v18 = vld [vmem:[#allocation2] sm:$0xff] }
  0x48   :  { %728 = vmatpush3.bf16.msra.mxu1 %v727_v51  ;;  %698 = vmatprep.subr.bf16.mxu0 %v697_v52  ;;  %v78_v13 = vld [vmem:[#allocation7 + $0x60] sm:$0xff]  ;;  %v79_v14 = vld [vmem:[#allocation7 + $0x68] sm:$0xff]  ;;  %v62_v19 = vld [vmem:[#allocation5] sm:$0xff]  ;;  %v737_v22 = vpack.c.bf16 %v127_v11, %v126_v10  ;;  %v61_v26 = vmul.f32 4.0, %v60_v18 }
  0x49   :  { %730 = vmatprep.subr.bf16.mxu1 %v729_v57  ;;  %v110_v17 = vld [vmem:[#allocation7 + $0x160] sm:$0xff]  ;;  %v111_v23 = vld [vmem:[#allocation7 + $0x168] sm:$0xff]  ;;  %v96_v24 = vld [vmem:[#allocation7 + $0xf0] sm:$0xff]  ;;  %v63_v27 = vmul.f32 0.044762004, %v62_v19  ;;  %v707_v30 = vpack.c.bf16 %v79_v14, %v78_v13  ;;  %v217_v57 = vsub.s32 5, %v978_v5 }
  0x4a   :  { %v97_v25 = vld [vmem:[#allocation7 + $0xf8] sm:$0xff]  ;;  %v128_v28 = vld [vmem:[#allocation7 + $0x1f0] sm:$0xff]  ;;  %v739_v32 = vpack.c.bf16 %v111_v23, %v110_v17  ;;  %v146_v41 = vld [vmem:[#allocation7 + $0x280] sm:$0xff] }
  0x4b   :  { %700 = vmatpush3.bf16.msra.mxu0 %v699_v63  ;;  %v129_v29 = vld [vmem:[#allocation7 + $0x1f8] sm:$0xff]  ;;  %v982_v31 = vadd.f32 %v63_v27, %v61_v26  ;;  %v709_v33 = vpack.c.bf16 %v97_v25, %v96_v24  ;;  %v80_v34 = vld [vmem:[#allocation7 + $0x70] sm:$0xff]  ;;  %v147_v42 = vld [vmem:[#allocation7 + $0x288] sm:$0xff] }
  0x4c   :  { %732 = vmatpush3.bf16.msra.mxu1 %v731_v0  ;;  %702 = vmatprep.subr.bf16.mxu0 %v701_v1  ;;  %v81_v35 = vld [vmem:[#allocation7 + $0x78] sm:$0xff]  ;;  %v112_v36 = vld [vmem:[#allocation7 + $0x170] sm:$0xff]  ;;  %v741_v37 = vpack.c.bf16 %v129_v29, %v128_v28  ;;  %v178_v44 = vld [vmem:[#allocation7 + $0x380] sm:$0xff]  ;;  %v745_v49 = vpack.c.bf16 %v147_v42, %v146_v41 }
  0x4d   :  { %734 = vmatprep.subr.bf16.mxu1 %v733_v6  ;;  %v113_v38 = vld [vmem:[#allocation7 + $0x178] sm:$0xff]  ;;  %v202_v39 = vrot.slane %v982_v31, %v201_v20  ;;  %v210_v40 = vrot.slane %v982_v31, %v209_v21  ;;  %v179_v45 = vld [vmem:[#allocation7 + $0x388] sm:$0xff]  ;;  %v711_v46 = vpack.c.bf16 %v81_v35, %v80_v34  ;;  %v130_v50 = vld [vmem:[#allocation7 + $0x200] sm:$0xff]  ;;  %v198_v58 = vrot.slane %v982_v31, %v197_v43 }
  0x4e   :  { %v743_v48 = vpack.c.bf16 %v113_v38, %v112_v36  ;;  %v131_v51 = vld [vmem:[#allocation7 + $0x208] sm:$0xff]  ;;  %v162_v52 = vld [vmem:[#allocation7 + $0x300] sm:$0xff]  ;;  %v777_v53 = vpack.c.bf16 %v179_v45, %v178_v44  ;;  %v148_v55 = vld [vmem:[#allocation7 + $0x290] sm:$0xff]  ;;  %v206_v62 = vrot.slane %v982_v31, %v205_v47  ;;  %v218_v10 = vrot.slane %v982_v31, %v217_v57 }
  0x4f   :  { %704 = vmatpush3.bf16.msra.mxu0 %v703_v12  ;;  %299 = vmatprep.mubr.f32.mxu0 %v202_v39  ;;  %v163_v54 = vld [vmem:[#allocation7 + $0x308] sm:$0xff]  ;;  %v149_v56 = vld [vmem:[#allocation7 + $0x298] sm:$0xff]  ;;  %v180_v59 = vld [vmem:[#allocation7 + $0x390] sm:$0xff]  ;;  %v747_v63 = vpack.c.bf16 %v131_v51, %v130_v50  ;;  %v226_v13 = vrot.slane %v982_v31, %v225_v61 }
  0x50   :  { %736 = vmatpush3.bf16.msra.mxu1 %v735_v15  ;;  %706 = vmatprep.subr.bf16.mxu0 %v705_v16  ;;  %v181_v60 = vld [vmem:[#allocation7 + $0x398] sm:$0xff]  ;;  %v779_v0 = vpack.c.bf16 %v163_v54, %v162_v52  ;;  %v749_v1 = vpack.c.bf16 %v149_v56, %v148_v55  ;;  %v132_v2 = vld [vmem:[#allocation7 + $0x210] sm:$0xff]  ;;  %v150_v8 = vld [vmem:[#allocation7 + $0x2a0] sm:$0xff] }
  0x51   :  { %738 = vmatprep.subr.bf16.mxu1 %v737_v22  ;;  %369 = vmatprep.mubr.f32.mxu1 %v210_v40  ;;  %v133_v3 = vld [vmem:[#allocation7 + $0x218] sm:$0xff]  ;;  %v164_v4 = vld [vmem:[#allocation7 + $0x310] sm:$0xff]  ;;  %v781_v6 = vpack.c.bf16 %v181_v60, %v180_v59  ;;  %v151_v9 = vld [vmem:[#allocation7 + $0x2a8] sm:$0xff] }
  0x52   :  { %v165_v7 = vld [vmem:[#allocation7 + $0x318] sm:$0xff]  ;;  %v182_v11 = vld [vmem:[#allocation7 + $0x3a0] sm:$0xff]  ;;  %v183_v12 = vld [vmem:[#allocation7 + $0x3a8] sm:$0xff]  ;;  %v751_v14 = vpack.c.bf16 %v133_v3, %v132_v2  ;;  %v753_v16 = vpack.c.bf16 %v151_v9, %v150_v8 }
  0x53   :  { %708 = vmatpush3.bf16.msra.mxu0 %v707_v30  ;;  %v783_v15 = vpack.c.bf16 %v165_v7, %v164_v4  ;;  %v134_v17 = vld [vmem:[#allocation7 + $0x220] sm:$0xff]  ;;  %v135_v18 = vld [vmem:[#allocation7 + $0x228] sm:$0xff]  ;;  %v785_v20 = vpack.c.bf16 %v183_v12, %v182_v11  ;;  %v152_v22 = vld [vmem:[#allocation7 + $0x2b0] sm:$0xff] }
  0x54   :  { %740 = vmatpush3.bf16.msra.mxu1 %v739_v32  ;;  %710 = vmatprep.subr.bf16.mxu0 %v709_v33  ;;  %v166_v19 = vld [vmem:[#allocation7 + $0x320] sm:$0xff]  ;;  %v167_v21 = vld [vmem:[#allocation7 + $0x328] sm:$0xff]  ;;  %v153_v23 = vld [vmem:[#allocation7 + $0x2b8] sm:$0xff]  ;;  %v755_v26 = vpack.c.bf16 %v135_v18, %v134_v17 }
  0x55   :  { %742 = vmatprep.subr.bf16.mxu1 %v741_v37  ;;  %v184_v24 = vld [vmem:[#allocation7 + $0x3b0] sm:$0xff]  ;;  %v185_v25 = vld [vmem:[#allocation7 + $0x3b8] sm:$0xff]  ;;  %v787_v27 = vpack.c.bf16 %v167_v21, %v166_v19  ;;  %v757_v28 = vpack.c.bf16 %v153_v23, %v152_v22  ;;  %v154_v35 = vld [vmem:[#allocation7 + $0x2c0] sm:$0xff]  ;;  %v221_v22 = vsub.s32 6, %v978_v5 }
  0x56   :  { %v136_v29 = vld [vmem:[#allocation7 + $0x230] sm:$0xff]  ;;  %v137_v30 = vld [vmem:[#allocation7 + $0x238] sm:$0xff]  ;;  %v789_v33 = vpack.c.bf16 %v185_v25, %v184_v24  ;;  %v155_v36 = vld [vmem:[#allocation7 + $0x2c8] sm:$0xff] }
  0x57   :  { %712 = vmatpush3.bf16.msra.mxu0 %v711_v46  ;;  %v168_v32 = vld [vmem:[#allocation7 + $0x330] sm:$0xff]  ;;  %v169_v34 = vld [vmem:[#allocation7 + $0x338] sm:$0xff]  ;;  %v186_v37 = vld [vmem:[#allocation7 + $0x3c0] sm:$0xff]  ;;  %v759_v39 = vpack.c.bf16 %v137_v30, %v136_v29  ;;  %v761_v41 = vpack.c.bf16 %v155_v36, %v154_v35  ;;  %v222_v25 = vrot.slane %v982_v31, %v221_v22 }
  0x58   :  { %744 = vmatpush3.bf16.msra.mxu1 %v743_v48  ;;  %746 = vmatprep.subr.bf16.mxu0 %v745_v49  ;;  %v187_v38 = vld [vmem:[#allocation7 + $0x3c8] sm:$0xff]  ;;  %v791_v40 = vpack.c.bf16 %v169_v34, %v168_v32  ;;  %v138_v42 = vld [vmem:[#allocation7 + $0x240] sm:$0xff]  ;;  %v156_v47 = vld [vmem:[#allocation7 + $0x2d0] sm:$0xff] }
  0x59   :  { %778 = vmatprep.subr.bf16.mxu1 %v777_v53  ;;  %v139_v43 = vld [vmem:[#allocation7 + $0x248] sm:$0xff]  ;;  %v170_v44 = vld [vmem:[#allocation7 + $0x340] sm:$0xff]  ;;  %v793_v45 = vpack.c.bf16 %v187_v38, %v186_v37  ;;  %v157_v48 = vld [vmem:[#allocation7 + $0x2d8] sm:$0xff] }
  0x5a   :  { %300 = vmatmul.mubr.f32.vlgmr.msra.gmra.mrb[0].mxu0 %v198_v58  ;;  %v171_v46 = vld [vmem:[#allocation7 + $0x348] sm:$0xff]  ;;  %v188_v49 = vld [vmem:[#allocation7 + $0x3d0] sm:$0xff]  ;;  %v189_v50 = vld [vmem:[#allocation7 + $0x3d8] sm:$0xff]  ;;  %v763_v51 = vpack.c.bf16 %v139_v43, %v138_v42  ;;  %v765_v53 = vpack.c.bf16 %v157_v48, %v156_v47 }
  0x5b   :  { %370 = vmatmul.mubr.f32.vlgmr.msra.gmra.mrb[0].mxu1 %v206_v62  ;;  %748 = vmatpush3.bf16.msra.mxu0 %v747_v63  ;;  %v795_v52 = vpack.c.bf16 %v171_v46, %v170_v44  ;;  %v140_v54 = vld [vmem:[#allocation7 + $0x250] sm:$0xff]  ;;  %v141_v55 = vld [vmem:[#allocation7 + $0x258] sm:$0xff]  ;;  %v797_v57 = vpack.c.bf16 %v189_v50, %v188_v49  ;;  %v158_v59 = vld [vmem:[#allocation7 + $0x2e0] sm:$0xff] }
  0x5c   :  { %780 = vmatpush3.bf16.msra.mxu1 %v779_v0  ;;  %750 = vmatprep.subr.bf16.mxu0 %v749_v1  ;;  %v172_v56 = vld [vmem:[#allocation7 + $0x350] sm:$0xff]  ;;  %v173_v58 = vld [vmem:[#allocation7 + $0x358] sm:$0xff]  ;;  %v159_v60 = vld [vmem:[#allocation7 + $0x2e8] sm:$0xff]  ;;  %v767_v63 = vpack.c.bf16 %v141_v55, %v140_v54 }
  0x5d   :  { %782 = vmatprep.subr.bf16.mxu1 %v781_v6  ;;  %439 = vmatprep.mubr.f32.mxu0 %v218_v10  ;;  %v190_v61 = vld [vmem:[#allocation7 + $0x3e0] sm:$0xff]  ;;  %v191_v62 = vld [vmem:[#allocation7 + $0x3e8] sm:$0xff]  ;;  %v799_v0 = vpack.c.bf16 %v173_v58, %v172_v56  ;;  %v769_v1 = vpack.c.bf16 %v159_v60, %v158_v59  ;;  %v160_v8 = vld [vmem:[#allocation7 + $0x2f0] sm:$0xff] }
  0x5e   :  { %509 = vmatprep.mubr.f32.mxu1 %v226_v13  ;;  %v142_v2 = vld [vmem:[#allocation7 + $0x260] sm:$0xff]  ;;  %v143_v3 = vld [vmem:[#allocation7 + $0x268] sm:$0xff]  ;;  %v801_v6 = vpack.c.bf16 %v191_v62, %v190_v61  ;;  %v161_v9 = vld [vmem:[#allocation7 + $0x2f8] sm:$0xff] }
  0x5f   :  { %752 = vmatpush3.bf16.msra.mxu0 %v751_v14  ;;  %v174_v4 = vld [vmem:[#allocation7 + $0x360] sm:$0xff]  ;;  %v175_v7 = vld [vmem:[#allocation7 + $0x368] sm:$0xff]  ;;  %v192_v10 = vld [vmem:[#allocation7 + $0x3f0] sm:$0xff]  ;;  %v771_v12 = vpack.c.bf16 %v143_v3, %v142_v2  ;;  %v773_v14 = vpack.c.bf16 %v161_v9, %v160_v8 }
  0x60   :  { %784 = vmatpush3.bf16.msra.mxu1 %v783_v15  ;;  %754 = vmatprep.subr.bf16.mxu0 %v753_v16  ;;  %v193_v11 = vld [vmem:[#allocation7 + $0x3f8] sm:$0xff]  ;;  %v803_v13 = vpack.c.bf16 %v175_v7, %v174_v4  ;;  %v144_v15 = vld [vmem:[#allocation7 + $0x270] sm:$0xff] }
  0x61   :  { %786 = vmatprep.subr.bf16.mxu1 %v785_v20  ;;  %v145_v16 = vld [vmem:[#allocation7 + $0x278] sm:$0xff]  ;;  %v805_v17 = vpack.c.bf16 %v193_v11, %v192_v10  ;;  %v176_v18 = vld [vmem:[#allocation7 + $0x370] sm:$0xff]  ;;  %v213_v20 = vsub.s32 4, %v978_v5 }
  0x62   :  { %v177_v19 = vld [vmem:[#allocation7 + $0x378] sm:$0xff]  ;;  %v775_v21 = vpack.c.bf16 %v145_v16, %v144_v15  ;;  %v521_v43 = vld [vmem:[%s1016_s3] sm:$0x1] }
  0x63   :  { %756 = vmatpush3.bf16.msra.mxu0 %v755_v26  ;;  %v807_v23 = vpack.c.bf16 %v177_v19, %v176_v18  ;;  %v214_v24 = vrot.slane %v982_v31, %v213_v20  ;;  %v915_v26 = vmov 0.0   ;;  %v522_v44 = vmul.f32 4.0, %v521_v43 }
  0x64   :  { %788 = vmatpush3.bf16.msra.mxu1 %v787_v27  ;;  %758 = vmatprep.subr.bf16.mxu0 %v757_v28  ;;  %59 = vst [vmem:[#allocation8] sm:$0x1] %v915_v26 }
  0x65   :  { %790 = vmatprep.subr.bf16.mxu1 %v789_v33 }
  0x67   :  { %760 = vmatpush3.bf16.msra.mxu0 %v759_v39 }
  0x68   :  { %792 = vmatpush3.bf16.msra.mxu1 %v791_v40  ;;  %762 = vmatprep.subr.bf16.mxu0 %v761_v41 }
  0x69   :  { %794 = vmatprep.subr.bf16.mxu1 %v793_v45 }
  0x6b   :  { %764 = vmatpush3.bf16.msra.mxu0 %v763_v51  ;;  %v65_v31 = vld [vmem:[#allocation8] sm:$0x1] }
  0x6c   :  { %796 = vmatpush3.bf16.msra.mxu1 %v795_v52  ;;  %766 = vmatprep.subr.bf16.mxu0 %v765_v53 }
  0x6d   :  { %798 = vmatprep.subr.bf16.mxu1 %v797_v57 }
  0x6f   :  { %768 = vmatpush3.bf16.msra.mxu0 %v767_v63 }
  0x70   :  { %800 = vmatpush3.bf16.msra.mxu1 %v799_v0  ;;  %770 = vmatprep.subr.bf16.mxu0 %v769_v1 }
  0x71   :  { %802 = vmatprep.subr.bf16.mxu1 %v801_v6 }
  0x73   :  { %772 = vmatpush3.bf16.msra.mxu0 %v771_v12 }
  0x74   :  { %804 = vmatpush3.bf16.msra.mxu1 %v803_v13  ;;  %774 = vmatprep.subr.bf16.mxu0 %v773_v14 }
  0x75   :  { %806 = vmatprep.subr.bf16.mxu1 %v805_v17 }
  0x77   :  { %776 = vmatpush3.bf16.msra.mxu0 %v775_v21 }
  0x78   :  { %808 = vmatpush3.bf16.msra.mxu1 %v807_v23 }
  0x7a   :  { %440 = vmatmul.mubr.f32.vlgmr.msra.gmra.mrb[2].mxu0 %v214_v24 }
  0x7b   :  { %510 = vmatmul.mubr.f32.vlgmr.msra.gmra.mrb[2].mxu1 %v222_v25 }
 0x12d   :  { %v573_v27 = vpop.f32.mrb[0].mxu0 }
 0x12e   :  { %v608_v28 = vpop.f32.mrb[0].mxu1  ;;  %v574_v29 = vpop.f32.mrb[1].mxu0 }
 0x12f   :  { %v575_v30 = vadd.f32 %v574_v29, %v573_v27  ;;  %v609_v32 = vpop.f32.mrb[1].mxu1 }
 0x130   :  { %v610_v5 = vadd.f32 %v609_v32, %v608_v28 }
 0x132   :  { %v372_v33 = vadd.f32 %v610_v5, %v575_v30 }
 0x14d   :  { %v643_v34 = vpop.f32.mrb[2].mxu0 }
 0x14e   :  { %v644_v35 = vpop.f32.mrb[3].mxu0  ;;  %v678_v36 = vpop.f32.mrb[2].mxu1 }
 0x14f   :  { %v645_v37 = vadd.f32 %v644_v35, %v643_v34  ;;  %v679_v38 = vpop.f32.mrb[3].mxu1 }
 0x150   :  { %v680_v39 = vadd.f32 %v679_v38, %v678_v36 }
 0x151   :  { %v442_v40 = vadd.f32 %v645_v37, %v372_v33 }
 0x153   :  { %v512_v41 = vadd.f32 %v680_v39, %v442_v40 }
 0x155   :  { %v515_v42 = vadd.f32 %v512_v41, %v65_v31 }
 0x157   :  { %516 = vst [vmem:[#allocation8] sm:$0x1] %v515_v42 }
 0x15e   :  { %v520_v45 = vld [vmem:[#allocation8] sm:$0x1] }
 0x15f   :  { %v523_v46 = vadd.f32 %v522_v44, %v520_v45 }
 0x161   :  { %524 = vst [vmem:[#allocation8] sm:$0x1] %v523_v46 }
 0x162   :  { %893 = shalt.err (!%p890_p0)
}
 0x163   :  { %s894_s6 = scalar_lea.hbm %s1017_s4, 16 }
 0x164   :  { %p895_p1 = scmp.ne.s32.totalorder %s1017_s4, %s894_s6  ;;  %p898_p2 = scmp.lt.u32.totalorder %s894_s6, %s1017_s4 }
 0x166   :  { %p900_p3 = pnand %p898_p2, %p895_p1 }
 0x168   :  { %903 = shalt.err (!%p900_p3)
}
 0x169   :  { %534 = dma.vmem_to_hbm [thread:$0]  %s532_s27, 16, %s1017_s4, [#allocation4]  }
 0x16a   :  { %908 = dma.done.wait [#allocation4], 16  }
 0x16b   :  { %909 = vsyncadd [#allocation4], 4294967280 }
 0x16c   :  { %538 = vsyncpa [#allocation3], 1 }
 0x16d   :  { %539 = vsyncpa [#allocation6], 1 }
 0x16e   :  { %540 = vsyncpa [#allocation4], 1 }

</bundles_post_ra>
